<compile_context>
chip_gen: v6e
topology: v6e:2x2x1
jax: 0.10.0
libtpu: 0.0.40
codegen_flags: <defaults>
</compile_context>

<pallas_src>
import functools
import math

import jax
import jax.numpy as jnp
from jax.experimental import pallas as pl
from jax.experimental.pallas import tpu as pltpu


# ----------------------------- kernels --------------------------------------


def _pe_add_kernel(x_ref, pos_ref, o_ref):
    # x_ref: (tile_s, B, E); pos_ref: (tile_s, 1, E) -> broadcast over batch
    o_ref[...] = x_ref[...] + pos_ref[...]


def _pe_add_dropout_kernel(x_ref, pos_ref, bits_ref, o_ref, *, threshold, scale):
    # inverted dropout: keep with prob (1 - rate), scale kept values by 1/(1-rate)
    # integer-threshold compare on raw uint32 bits (no u32->f32 convert, unbiased)
    y = x_ref[...] + pos_ref[...]
    keep = bits_ref[...] >= jnp.uint32(threshold)
    o_ref[...] = jnp.where(keep, y * jnp.asarray(scale, y.dtype), jnp.zeros_like(y))


# ----------------------------- wrapper ---------------------------------------

_TARGET_BLOCK_BYTES = 2 * 1024 * 1024    # ~2 MiB per x / out block
_VMEM_LIMIT_BYTES = 32 * 1024 * 1024     # within scoped VMEM on v5e/v6e/v7x


def _pick_tile_s(S, row_bytes):
    tile_s = max(1, _TARGET_BLOCK_BYTES // row_bytes)
    if tile_s >= 8:
        tile_s -= tile_s % 8             # sublane-friendly multiple of 8
    return int(min(tile_s, S))


def positional_encoding(token_embedding, pos_embedding, *, dropout=0.1,
                        training=False, rng_key=None):
    """token_embedding: (S, B, E); pos_embedding: (maxlen, 1, E)."""
    S, B, E = token_embedding.shape
    pos = pos_embedding[:S].astype(token_embedding.dtype)   # (S, 1, E) glue slice

    row_bytes = B * E * token_embedding.dtype.itemsize
    tile_s = _pick_tile_s(S, row_bytes)
    grid = (pl.cdiv(S, tile_s),)         # ragged tail handled by masked boundary block

    x_spec = pl.BlockSpec((tile_s, B, E), lambda i: (i, 0, 0))
    p_spec = pl.BlockSpec((tile_s, 1, E), lambda i: (i, 0, 0))
    o_spec = pl.BlockSpec((tile_s, B, E), lambda i: (i, 0, 0))
    out_shape = jax.ShapeDtypeStruct((S, B, E), token_embedding.dtype)

    params = pltpu.CompilerParams(
        dimension_semantics=("parallel",),          # steps independent -> megacore OK
        vmem_limit_bytes=_VMEM_LIMIT_BYTES,
    )

    if training and dropout > 0.0:
        if rng_key is None:
            rng_key = jax.random.PRNGKey(0)
        # RNG bits generated in the wrapper (glue); mask/select/scale stays in-kernel.
        # TODO(synk): on hardware, pltpu.prng_random_bits inside the kernel would
        # avoid this extra HBM read, but it has no CPU-interpret lowering.
        bits = jax.random.bits(rng_key, (S, B, E), dtype=jnp.uint32)
        threshold = min(int(round(float(dropout) * 2.0 ** 32)), 2 ** 32 - 1)
        scale = 1.0 / (1.0 - float(dropout))
        b_spec = pl.BlockSpec((tile_s, B, E), lambda i: (i, 0, 0))
        kernel = functools.partial(_pe_add_dropout_kernel,
                                   threshold=threshold, scale=scale)
        return pl.pallas_call(
            kernel,
            grid=grid,
            in_specs=[x_spec, p_spec, b_spec],
            out_specs=o_spec,
            out_shape=out_shape,
            compiler_params=params,
        )(token_embedding, pos, bits)

    # eval mode: dropout is identity
    return pl.pallas_call(
        _pe_add_kernel,
        grid=grid,
        in_specs=[x_spec, p_spec],
        out_specs=o_spec,
        out_shape=out_shape,
        compiler_params=params,
    )(token_embedding, pos)


# ----------------------------- main ------------------------------------------

if __name__ == "__main__":
    emb_size = 32
    maxlen = 64
    dropout = 0.1
    S, B = 8, 2   # seq, batch

    # module buffer: sinusoidal positional table (deterministic, matches PyTorch init)
    den = jnp.exp(-jnp.arange(0, emb_size, 2, dtype=jnp.float32)
                  * (math.log(10000.0) / emb_size))
    positions = jnp.arange(0, maxlen, dtype=jnp.float32).reshape(maxlen, 1)
    pe = jnp.zeros((maxlen, emb_size), jnp.float32)
    pe = pe.at[:, 0::2].set(jnp.sin(positions * den))
    pe = pe.at[:, 1::2].set(jnp.cos(positions * den))
    pos_embedding = pe[:, None, :]            # (maxlen, 1, emb_size)

    key = jax.random.PRNGKey(0)
    k_x, k_drop = jax.random.split(key)
    token_embedding = jax.random.normal(k_x, (S, B, emb_size), jnp.float32)

    # eval-mode forward (dropout = identity), hot path in Pallas
    out = positional_encoding(token_embedding, pos_embedding,
                              dropout=dropout, training=False)
    out = jax.block_until_ready(out)

    ref = token_embedding + pos_embedding[:S]
    assert out.shape == (S, B, emb_size)
    assert jnp.allclose(out, ref, atol=1e-6), "eval mismatch vs reference"

    # training-mode forward (stochastic mask; cannot bitwise-match torch RNG)
    out_tr = positional_encoding(token_embedding, pos_embedding,
                                 dropout=dropout, training=True, rng_key=k_drop)
    out_tr = jax.block_until_ready(out_tr)
    scale = 1.0 / (1.0 - dropout)
    consistent = (out_tr == 0) | jnp.isclose(out_tr, ref * scale, atol=1e-5)
    assert bool(jnp.all(consistent)), "train output not consistent with dropout(x+pos)"

    print("KERNEL_OK")
</pallas_src>

<mosaic_0001>
module attributes {stable_mosaic.version = 11 : i64} {
  func.func @_pe_add_kernel(%arg0: i32, %arg1: memref<8x2x32xf32, #tpu.memory_space<vmem>>, %arg2: memref<8x1x32xf32, #tpu.memory_space<vmem>>, %arg3: memref<8x2x32xf32, #tpu.memory_space<vmem>>) attributes {dimension_semantics = [#tpu.dimension_semantics<parallel>], iteration_bounds = array<i64: 1>, scalar_prefetch = 0 : i64, scratch_operands = 0 : i64, tpu.core_type = #tpu.core_type<tc>, window_params = [{transform_indices = @transform_0, window_bounds = array<i64: 8, 2, 32>}, {transform_indices = @transform_1, window_bounds = array<i64: 8, 1, 32>}, {transform_indices = @transform_2, window_bounds = array<i64: 8, 2, 32>}]} {
    %c0 = arith.constant 0 : index
    %c0_0 = arith.constant 0 : index
    %c0_1 = arith.constant 0 : index
    %0 = vector.load %arg1[%c0, %c0_0, %c0_1] : memref<8x2x32xf32, #tpu.memory_space<vmem>>, vector<8x2x32xf32>
    %c0_2 = arith.constant 0 : index
    %c0_3 = arith.constant 0 : index
    %c0_4 = arith.constant 0 : index
    %1 = vector.load %arg2[%c0_2, %c0_3, %c0_4] : memref<8x1x32xf32, #tpu.memory_space<vmem>>, vector<8x1x32xf32>
    %2 = vector.broadcast %1 : vector<8x1x32xf32> to vector<8x2x32xf32>
    %3 = arith.addf %0, %2 : vector<8x2x32xf32>
    %c0_5 = arith.constant 0 : index
    %c0_6 = arith.constant 0 : index
    %c0_7 = arith.constant 0 : index
    %4 = vector.load %arg3[%c0_5, %c0_6, %c0_7] : memref<8x2x32xf32, #tpu.memory_space<vmem>>, vector<8x2x32xf32>
    tpu.vector_store %arg3[%c0_5, %c0_6, %c0_7], %3 {strides = array<i32>} : memref<8x2x32xf32, #tpu.memory_space<vmem>>, vector<8x2x32xf32>,
    return
  }
  func.func @transform_0(%arg0: i32) -> (i32, i32, i32) {
    %c0_i32 = arith.constant 0 : i32
    %c0_i32_0 = arith.constant 0 : i32
    %c0_i32_1 = arith.constant 0 : i32
    return %arg0, %c0_i32, %c0_i32_0 : i32, i32, i32
  }
  func.func @transform_1(%arg0: i32) -> (i32, i32, i32) {
    %c0_i32 = arith.constant 0 : i32
    %c0_i32_0 = arith.constant 0 : i32
    %c0_i32_1 = arith.constant 0 : i32
    return %arg0, %c0_i32, %c0_i32_0 : i32, i32, i32
  }
  func.func @transform_2(%arg0: i32) -> (i32, i32, i32) {
    %c0_i32 = arith.constant 0 : i32
    %c0_i32_0 = arith.constant 0 : i32
    %c0_i32_1 = arith.constant 0 : i32
    return %arg0, %c0_i32, %c0_i32_0 : i32, i32, i32
  }
}

</mosaic_0001>

<bundles_post_ra>
// kernel: tpu_custom_call.1
= control target key start
LH: loop header
LB: loop body
LE: loop exit
PB: predicated region body
PF: predicated region fallthrough
CT: control target
= control target key end

     0   :  { %7 = vsyncpa [#allocation3], 0  ;;  %s268_s0 = inlined_call_operand.hbm [shape: f32[8,2,32], index: 0, kind: input, shape index: {}]   ;;  %s269_s1 = inlined_call_operand.hbm [shape: f32[8,1,32], index: 1, kind: input, shape index: {}]   ;;  %s270_s2 = inlined_call_operand.hbm [shape: f32[8,2,32], index: 2, kind: output, shape index: {}]  }
   0x1   :  { %8 = vsyncpa [#allocation6], 0 }
   0x2   :  { %9 = vsyncpa [#allocation4], 0  ;;  %s220_s9 = smov [#allocation2]  }
   0x3   :  { %s15_s10 = sshll.u32 %s220_s9, 4  ;;  %s16_s10 = int_to_ptr.vmem [resolvable:$true] %s15_s10 }
   0x4   :  { %s162_s11 = scalar_lea.vmem %s16_s10, 256  ;;  %p167_p1 = scmp.lt.s32.totalorder %s16_s10, %s16_s10 }
   0x5   :  { %p163_p0 = scmp.ne.s32.totalorder %s16_s10, %s162_s11  ;;  %p168_p2 = scmp.lt.s32.totalorder %s162_s11, %s162_s11 }
   0x7   :  { %p169_p3 = por %p168_p2, %p167_p1 }
   0x9   :  { %p170_p4 = pnand %p169_p3, %p163_p0 }
   0xb   :  { %173 = shalt.err (!%p170_p4)
}
   0xc   :  { %s221_s12 = smov 32   ;;  %s222_s13 = smov 2  }
   0xd   :  { %21 = dma.hbm_to_vmem [thread:$0]  %s268_s0, 256, %s16_s10, [#allocation3], %s221_s12, %s221_s12, %s222_s13  }
   0xe   :  { %s223_s16 = smov [#allocation5]  }
   0xf   :  { %s27_s17 = sshll.u32 %s223_s16, 4  ;;  %s28_s17 = int_to_ptr.vmem [resolvable:$true] %s27_s17 }
  0x10   :  { %s182_s18 = scalar_lea.vmem %s28_s17, 128  ;;  %p187_p6 = scmp.lt.s32.totalorder %s28_s17, %s28_s17 }
  0x11   :  { %p183_p5 = scmp.ne.s32.totalorder %s28_s17, %s182_s18  ;;  %p188_p7 = scmp.lt.s32.totalorder %s182_s18, %s182_s18 }
  0x13   :  { %p189_p8 = por %p188_p7, %p187_p6 }
  0x15   :  { %p190_p9 = pnand %p189_p8, %p183_p5 }
  0x17   :  { %193 = shalt.err (!%p190_p9)
}
  0x18   :  { %s224_s19 = smov 16   ;;  %s225_s20 = smov 1  }
  0x19   :  { %33 = dma.hbm_to_vmem [thread:$0]  %s269_s1, 128, %s28_s17, [#allocation6], %s224_s19, %s224_s19, %s225_s20  }
  0x1a   :  { %214 = dma.done.wait [#allocation3], 256  }
  0x1b   :  { %215 = vsyncadd [#allocation3], 4294967040 }
  0x1c   :  { %216 = dma.done.wait [#allocation6], 128  }
  0x1d   :  { %217 = vsyncadd [#allocation6], 4294967168  ;;  %vm112_vm0 = vcmask 254976   ;;  %s226_s0 = smov [#allocation7]   ;;  %v40_v0 = vld [vmem:[#allocation2] sm:$0x3] }
  0x1e   :  { %s251_s23 = sshll.u32 %s226_s0, 4  ;;  %v139_v1 = vld [vmem:[#allocation5] ss:$0 sm:$0xff]  ;;  %v41_v2 = vld [vmem:[#allocation2 + $0x2] sm:$0x3]  ;;  %s127_s23 = int_to_ptr.vmem [resolvable:$true] %s251_s23 }
  0x1f   :  { %v104_v3 = vadd.f32 %v139_v1, %v40_v0  ;;  %v140_v4 = vld [vmem:[#allocation5 + $0x1] ss:$0 sm:$0xff]  ;;  %v42_v5 = vld [vmem:[#allocation2 + $0x4] sm:$0x3]  ;;  %v141_v6 = vld [vmem:[#allocation5 + $0x2] ss:$0 sm:$0xff]  ;;  %p199_p11 = scmp.lt.s32.totalorder %s127_s23, %s127_s23 }
  0x20   :  { %v105_v7 = vadd.f32 %v140_v4, %v41_v2  ;;  %v106_v8 = vadd.f32 %v141_v6, %v42_v5  ;;  %v43_v9 = vld [vmem:[#allocation2 + $0x6] sm:$0x3]  ;;  %v142_v10 = vld [vmem:[#allocation5 + $0x3] ss:$0 sm:$0xff]  ;;  %v44_v11 = vld [vmem:[#allocation2 + $0x8] sm:$0x3] }
  0x21   :  { %113 = vst.msk [vmem:[#allocation7] sm:$0x3] %vm112_vm0, %v104_v3  ;;  %v107_v12 = vadd.f32 %v142_v10, %v43_v9  ;;  %v143_v13 = vld [vmem:[#allocation5 + $0x4] ss:$0 sm:$0xff]  ;;  %v45_v14 = vld [vmem:[#allocation2 + $0xa] sm:$0x3] }
  0x22   :  { %v144_v15 = vld [vmem:[#allocation5 + $0x5] ss:$0 sm:$0xff]  ;;  %114 = vst.msk [vmem:[#allocation7 + $0x2] sm:$0x3] %vm112_vm0, %v105_v7  ;;  %115 = vst.msk [vmem:[#allocation7 + $0x4] sm:$0x3] %vm112_vm0, %v106_v8  ;;  %v108_v16 = vadd.f32 %v143_v13, %v44_v11 }
  0x23   :  { %v109_v17 = vadd.f32 %v144_v15, %v45_v14  ;;  %v46_v18 = vld [vmem:[#allocation2 + $0xc] sm:$0x3]  ;;  %v145_v19 = vld [vmem:[#allocation5 + $0x6] ss:$0 sm:$0xff]  ;;  %v47_v20 = vld [vmem:[#allocation2 + $0xe] sm:$0x3] }
  0x24   :  { %116 = vst.msk [vmem:[#allocation7 + $0x6] sm:$0x3] %vm112_vm0, %v107_v12  ;;  %v110_v21 = vadd.f32 %v145_v19, %v46_v18  ;;  %v146_v22 = vld [vmem:[#allocation5 + $0x7] ss:$0 sm:$0xff]  ;;  %117 = vst.msk [vmem:[#allocation7 + $0x8] sm:$0x3] %vm112_vm0, %v108_v16 }
  0x25   :  { %118 = vst.msk [vmem:[#allocation7 + $0xa] sm:$0x3] %vm112_vm0, %v109_v17  ;;  %v111_v23 = vadd.f32 %v146_v22, %v47_v20  ;;  %s194_s1 = scalar_lea.vmem %s127_s23, 256 }
  0x26   :  { %119 = vst.msk [vmem:[#allocation7 + $0xc] sm:$0x3] %vm112_vm0, %v110_v21  ;;  %p195_p10 = scmp.ne.s32.totalorder %s127_s23, %s194_s1  ;;  %p200_p12 = scmp.lt.s32.totalorder %s194_s1, %s194_s1 }
  0x27   :  { %120 = vst.msk [vmem:[#allocation7 + $0xe] sm:$0x3] %vm112_vm0, %v111_v23 }
  0x28   :  { %p201_p13 = por %p200_p12, %p199_p11 }
  0x2a   :  { %p202_p0 = pnand %p201_p13, %p195_p10 }
  0x2c   :  { %205 = shalt.err (!%p202_p0)
}
  0x2d   :  { %132 = dma.vmem_to_hbm [thread:$0]  %s127_s23, 256, %s270_s2, [#allocation4], %s221_s12, %s221_s12, %s222_s13  }
  0x2e   :  { %218 = dma.done.wait [#allocation4], 256  }
  0x2f   :  { %219 = vsyncadd [#allocation4], 4294967040 }
  0x30   :  { %136 = vsyncpa [#allocation3], 1 }
  0x31   :  { %137 = vsyncpa [#allocation6], 1 }
  0x32   :  { %138 = vsyncpa [#allocation4], 1 }

</bundles_post_ra>
